<compile_context>
chip_gen: v5e
topology: v5e:2x2
jax: 0.10.0
libtpu: 0.0.40
codegen_flags: <defaults>
</compile_context>

<pallas_src>
import jax
import jax.numpy as jnp
from jax.experimental import pallas as pl
from jax.experimental.pallas import tpu as pltpu


LANE = 128
SUBLANE = 8
HID_P = LANE        # hidden width 50 zero-padded to one lane tile (exact)
OUT_W = 2           # true logit width; output array is (B, 2), no post-slice
MAX_TB = 4096       # batch-tile cap (sweepable 2048..8192); few-MiB working set


def _round_up(n, m):
    return ((n + m - 1) // m) * m


def _pad2d(x, rows, cols):
    r, c = x.shape
    return jnp.pad(x, ((0, rows - r), (0, cols - c)))


def _leaky_relu(x, slope=0.1):
    return jnp.where(x > 0, x, slope * x)


def _mlp_kernel(x_ref, w1_ref, w23_ref, w4t_ref, b_ref, o_ref):
    """One batch tile: 3 MXU matmuls + VPU/XLU final layer; weights VMEM-resident."""
    x = x_ref[...]                                    # (TB, z_dim), unpadded K
    b = b_ref[...]                                    # (4, HID_P), zero padded

    h = jnp.dot(x, w1_ref[...], preferred_element_type=jnp.float32) + b[0]
    h = _leaky_relu(h)
    h = jnp.dot(h, w23_ref[0], preferred_element_type=jnp.float32) + b[1]
    h = _leaky_relu(h)
    h = jnp.dot(h, w23_ref[1], preferred_element_type=jnp.float32) + b[2]
    h = _leaky_relu(h)

    # Layer 4 (128 -> 2) off the MXU: broadcast-mul on the VPU + cross-lane
    # reduce on the XLU for each of the 2 real output columns.  Padded lanes
    # of h and w4t are exactly zero, so the 128-lane sum equals the 50-wide sum.
    w4t = w4t_ref[...]                                # (2, HID_P), transposed
    o0 = jnp.sum(h * w4t[0], axis=-1, keepdims=True)  # (TB, 1)
    o1 = jnp.sum(h * w4t[1], axis=-1, keepdims=True)  # (TB, 1)
    out = jnp.concatenate([o0, o1], axis=-1) + b[3, :OUT_W]
    o_ref[...] = out.astype(o_ref.dtype)


def prepare_params(params):
    """Pad/pack parameters once (hoisted out of the per-call forward).

    params: w1..w4 stored as (in_features, out_features), b1..b4 as (out,).
    Only the hidden (output) dimension is padded to 128 lanes; z_dim is NOT
    padded, so the input path is a pure streamed DMA of the caller's array.
    """
    z_dim = params["w1"].shape[0]
    w1 = _pad2d(params["w1"].astype(jnp.float32), z_dim, HID_P)       # (z_dim, 128)
    w23 = jnp.stack([
        _pad2d(params["w2"].astype(jnp.float32), HID_P, HID_P),
        _pad2d(params["w3"].astype(jnp.float32), HID_P, HID_P),
    ])                                                                # (2, 128, 128)
    w4t = _pad2d(params["w4"].astype(jnp.float32).T, OUT_W, HID_P)    # (2, 128)
    b = jnp.stack([
        jnp.pad(params[f"b{i}"].astype(jnp.float32),
                (0, HID_P - params[f"b{i}"].shape[0]))
        for i in (1, 2, 3, 4)
    ])                                                                # (4, 128)
    return {"w1": w1, "w23": w23, "w4t": w4t, "b": b}


def _choose_tile(B):
    """Batch-tile size: single tile for tiny batches; otherwise an even tile
    count (v7x shards the 'parallel' axis across its 2 TensorCores), with at
    most MAX_TB rows per tile."""
    if B <= 2 * SUBLANE:
        return _round_up(B, SUBLANE)
    if B <= MAX_TB:
        return _round_up((B + 1) // 2, SUBLANE)       # 2 balanced tiles
    n = -(-B // MAX_TB)                               # minimum tile count
    if n % 2:
        n += 1                                        # even for megacore balance
    return _round_up(-(-B // n), SUBLANE)


@jax.jit
def discriminator_forward(z, packed):
    """z: (B, z_dim); packed: output of prepare_params. Matches Discriminator.forward."""
    B, z_dim = z.shape
    TB = _choose_tile(B)
    n_tiles = pl.cdiv(B, TB)

    flops = 2 * B * (z_dim * HID_P + 2 * HID_P * HID_P + HID_P * OUT_W)
    bytes_accessed = 4 * (B * z_dim + B * OUT_W + packed["w1"].size
                          + packed["w23"].size + packed["w4t"].size
                          + packed["b"].size)

    out = pl.pallas_call(
        _mlp_kernel,
        out_shape=jax.ShapeDtypeStruct((B, OUT_W), jnp.float32),
        grid=(n_tiles,),
        in_specs=[
            pl.BlockSpec((TB, z_dim), lambda i: (i, 0)),             # x: streamed
            # Weight/bias index_maps are constant -> fetched once, VMEM-resident
            # across all batch tiles.
            pl.BlockSpec((z_dim, HID_P), lambda i: (0, 0)),          # w1
            pl.BlockSpec((2, HID_P, HID_P), lambda i: (0, 0, 0)),    # w2 / w3
            pl.BlockSpec((OUT_W, HID_P), lambda i: (0, 0)),          # w4^T
            pl.BlockSpec((4, HID_P), lambda i: (0, 0)),              # biases
        ],
        out_specs=pl.BlockSpec((TB, OUT_W), lambda i: (i, 0)),
        compiler_params=pltpu.CompilerParams(
            dimension_semantics=("parallel",)),
        cost_estimate=pl.CostEstimate(
            flops=flops, transcendentals=0, bytes_accessed=bytes_accessed),
    )(z.astype(jnp.float32), packed["w1"], packed["w23"], packed["w4t"],
      packed["b"])

    # PyTorch .squeeze(): drop all size-1 dims (e.g. B == 1 -> shape (2,)).
    return jnp.squeeze(out)


def init_params(key, z_dim):
    """normal_init: weights ~ N(0, 0.02), biases = 0 (matches module's weight_init)."""
    ks = jax.random.split(key, 4)
    dims = [(z_dim, 50), (50, 50), (50, 50), (50, 2)]
    params = {}
    for i, ((fin, fout), k) in enumerate(zip(dims, ks), start=1):
        params[f"w{i}"] = 0.02 * jax.random.normal(k, (fin, fout), dtype=jnp.float32)
        params[f"b{i}"] = jnp.zeros((fout,), dtype=jnp.float32)
    return params


def _ref(z, p):
    h = z @ p["w1"] + p["b1"]
    h = jnp.where(h > 0, h, 0.1 * h)
    h = h @ p["w2"] + p["b2"]
    h = jnp.where(h > 0, h, 0.1 * h)
    h = h @ p["w3"] + p["b3"]
    h = jnp.where(h > 0, h, 0.1 * h)
    return jnp.squeeze(h @ p["w4"] + p["b4"])


if __name__ == "__main__":
    z_dim = 8
    batch = 2

    key = jax.random.PRNGKey(0)
    k_params, k_z, k_z2, k_z3 = jax.random.split(key, 4)

    params = init_params(k_params, z_dim)
    packed = prepare_params(params)   # pad/pack once, reused across calls

    # Small batch (single grid step, masked partial block).
    z = jax.random.normal(k_z, (batch, z_dim), dtype=jnp.float32)
    out = jax.block_until_ready(discriminator_forward(z, packed))
    expected = _ref(z, params)
    assert out.shape == expected.shape == (batch, 2)
    assert jnp.allclose(out, expected, atol=1e-5, rtol=1e-5)

    # Larger batch: two balanced tiles + a masked tail in the last tile.
    z_big = jax.random.normal(k_z2, (2600, z_dim), dtype=jnp.float32)
    out_big = jax.block_until_ready(discriminator_forward(z_big, packed))
    expected_big = _ref(z_big, params)
    assert out_big.shape == expected_big.shape == (2600, 2)
    assert jnp.allclose(out_big, expected_big, atol=1e-4, rtol=1e-4)

    # batch = 1 exercises PyTorch .squeeze() semantics (-> shape (2,)).
    z_one = jax.random.normal(k_z3, (1, z_dim), dtype=jnp.float32)
    out_one = jax.block_until_ready(discriminator_forward(z_one, packed))
    expected_one = _ref(z_one, params)
    assert out_one.shape == expected_one.shape == (2,)
    assert jnp.allclose(out_one, expected_one, atol=1e-5, rtol=1e-5)

    print("KERNEL_OK")
</pallas_src>

<mosaic_0001>
module attributes {stable_mosaic.version = 11 : i64} {
  func.func @_mlp_kernel(%arg0: i32, %arg1: memref<8x8xf32, #tpu.memory_space<vmem>>, %arg2: memref<8x128xf32, #tpu.memory_space<vmem>>, %arg3: memref<2x128x128xf32, #tpu.memory_space<vmem>>, %arg4: memref<2x128xf32, #tpu.memory_space<vmem>>, %arg5: memref<4x128xf32, #tpu.memory_space<vmem>>, %arg6: memref<8x2xf32, #tpu.memory_space<vmem>>) attributes {dimension_semantics = [#tpu.dimension_semantics<parallel>], iteration_bounds = array<i64: 1>, scalar_prefetch = 0 : i64, scratch_operands = 0 : i64, tpu.core_type = #tpu.core_type<tc>, window_params = [{transform_indices = @transform_0, window_bounds = array<i64: 8, 8>}, {pipeline_mode = #tpu.pipeline_mode<synchronous>, transform_indices = @transform_1, window_bounds = array<i64: 8, 128>}, {pipeline_mode = #tpu.pipeline_mode<synchronous>, transform_indices = @transform_2, window_bounds = array<i64: 2, 128, 128>}, {pipeline_mode = #tpu.pipeline_mode<synchronous>, transform_indices = @transform_3, window_bounds = array<i64: 2, 128>}, {pipeline_mode = #tpu.pipeline_mode<synchronous>, transform_indices = @transform_4, window_bounds = array<i64: 4, 128>}, {transform_indices = @transform_5, window_bounds = array<i64: 8, 2>}]} {
    %c0 = arith.constant 0 : index
    %c0_0 = arith.constant 0 : index
    %0 = vector.load %arg1[%c0, %c0_0] : memref<8x8xf32, #tpu.memory_space<vmem>>, vector<8x8xf32>
    %c0_1 = arith.constant 0 : index
    %c0_2 = arith.constant 0 : index
    %1 = vector.load %arg5[%c0_1, %c0_2] : memref<4x128xf32, #tpu.memory_space<vmem>>, vector<4x128xf32>
    %c0_3 = arith.constant 0 : index
    %c0_4 = arith.constant 0 : index
    %2 = vector.load %arg2[%c0_3, %c0_4] : memref<8x128xf32, #tpu.memory_space<vmem>>, vector<8x128xf32>
    %cst = arith.constant dense<0.000000e+00> : vector<8x128xf32>
    %3 = tpu.matmul %0, %2, %cst {dimension_numbers = #tpu.dot_dimension_numbers<[1], [0], [0], [1], [0, 0, 1, 1], [], []>} : vector<8x8xf32>, vector<8x128xf32>, vector<8x128xf32> -> vector<8x128xf32>
    %4 = vector.extract_strided_slice %1 {offsets = [0, 0], sizes = [1, 128], strides = [1, 1]} : vector<4x128xf32> to vector<1x128xf32>
    %5 = vector.shape_cast %4 : vector<1x128xf32> to vector<128xf32>
    %6 = vector.shape_cast %5 : vector<128xf32> to vector<1x128xf32>
    %7 = vector.broadcast %6 : vector<1x128xf32> to vector<8x128xf32>
    %8 = arith.addf %3, %7 : vector<8x128xf32>
    %cst_5 = arith.constant 0.000000e+00 : f32
    %9 = vector.broadcast %cst_5 : f32 to vector<8x128xf32>
    %10 = arith.cmpf ogt, %8, %9 : vector<8x128xf32>
    %cst_6 = arith.constant 1.000000e-01 : f32
    %11 = vector.broadcast %cst_6 : f32 to vector<8x128xf32>
    %12 = arith.mulf %11, %8 : vector<8x128xf32>
    %13 = arith.select %10, %8, %12 : vector<8x128xi1>, vector<8x128xf32>
    %c0_7 = arith.constant 0 : index
    %c0_8 = arith.constant 0 : index
    %c0_9 = arith.constant 0 : index
    %14 = vector.load %arg3[%c0_7, %c0_8, %c0_9] : memref<2x128x128xf32, #tpu.memory_space<vmem>>, vector<1x128x128xf32>
    %15 = vector.shape_cast %14 : vector<1x128x128xf32> to vector<128x128xf32>
    %cst_10 = arith.constant dense<0.000000e+00> : vector<8x128xf32>
    %16 = tpu.matmul %13, %15, %cst_10 {dimension_numbers = #tpu.dot_dimension_numbers<[1], [0], [0], [1], [0, 0, 1, 1], [], []>} : vector<8x128xf32>, vector<128x128xf32>, vector<8x128xf32> -> vector<8x128xf32>
    %17 = vector.extract_strided_slice %1 {offsets = [1, 0], sizes = [1, 128], strides = [1, 1]} : vector<4x128xf32> to vector<1x128xf32>
    %18 = vector.shape_cast %17 : vector<1x128xf32> to vector<128xf32>
    %19 = vector.shape_cast %18 : vector<128xf32> to vector<1x128xf32>
    %20 = vector.broadcast %19 : vector<1x128xf32> to vector<8x128xf32>
    %21 = arith.addf %16, %20 : vector<8x128xf32>
    %cst_11 = arith.constant 0.000000e+00 : f32
    %22 = vector.broadcast %cst_11 : f32 to vector<8x128xf32>
    %23 = arith.cmpf ogt, %21, %22 : vector<8x128xf32>
    %cst_12 = arith.constant 1.000000e-01 : f32
    %24 = vector.broadcast %cst_12 : f32 to vector<8x128xf32>
    %25 = arith.mulf %24, %21 : vector<8x128xf32>
    %26 = arith.select %23, %21, %25 : vector<8x128xi1>, vector<8x128xf32>
    %c1 = arith.constant 1 : index
    %c0_13 = arith.constant 0 : index
    %c0_14 = arith.constant 0 : index
    %27 = vector.load %arg3[%c1, %c0_13, %c0_14] : memref<2x128x128xf32, #tpu.memory_space<vmem>>, vector<1x128x128xf32>
    %28 = vector.shape_cast %27 : vector<1x128x128xf32> to vector<128x128xf32>
    %cst_15 = arith.constant dense<0.000000e+00> : vector<8x128xf32>
    %29 = tpu.matmul %26, %28, %cst_15 {dimension_numbers = #tpu.dot_dimension_numbers<[1], [0], [0], [1], [0, 0, 1, 1], [], []>} : vector<8x128xf32>, vector<128x128xf32>, vector<8x128xf32> -> vector<8x128xf32>
    %30 = vector.extract_strided_slice %1 {offsets = [2, 0], sizes = [1, 128], strides = [1, 1]} : vector<4x128xf32> to vector<1x128xf32>
    %31 = vector.shape_cast %30 : vector<1x128xf32> to vector<128xf32>
    %32 = vector.shape_cast %31 : vector<128xf32> to vector<1x128xf32>
    %33 = vector.broadcast %32 : vector<1x128xf32> to vector<8x128xf32>
    %34 = arith.addf %29, %33 : vector<8x128xf32>
    %cst_16 = arith.constant 0.000000e+00 : f32
    %35 = vector.broadcast %cst_16 : f32 to vector<8x128xf32>
    %36 = arith.cmpf ogt, %34, %35 : vector<8x128xf32>
    %cst_17 = arith.constant 1.000000e-01 : f32
    %37 = vector.broadcast %cst_17 : f32 to vector<8x128xf32>
    %38 = arith.mulf %37, %34 : vector<8x128xf32>
    %39 = arith.select %36, %34, %38 : vector<8x128xi1>, vector<8x128xf32>
    %c0_18 = arith.constant 0 : index
    %c0_19 = arith.constant 0 : index
    %40 = vector.load %arg4[%c0_18, %c0_19] : memref<2x128xf32, #tpu.memory_space<vmem>>, vector<2x128xf32>
    %41 = vector.extract_strided_slice %40 {offsets = [0, 0], sizes = [1, 128], strides = [1, 1]} : vector<2x128xf32> to vector<1x128xf32>
    %42 = vector.shape_cast %41 : vector<1x128xf32> to vector<128xf32>
    %43 = vector.shape_cast %42 : vector<128xf32> to vector<1x128xf32>
    %44 = vector.broadcast %43 : vector<1x128xf32> to vector<8x128xf32>
    %45 = arith.mulf %39, %44 : vector<8x128xf32>
    %cst_20 = arith.constant dense<0.000000e+00> : vector<8xf32>
    %46 = vector.multi_reduction <add>, %45, %cst_20 [1] : vector<8x128xf32> to vector<8xf32>
    %47 = vector.shape_cast %46 : vector<8xf32> to vector<8x1xf32>
    %48 = vector.extract_strided_slice %40 {offsets = [1, 0], sizes = [1, 128], strides = [1, 1]} : vector<2x128xf32> to vector<1x128xf32>
    %49 = vector.shape_cast %48 : vector<1x128xf32> to vector<128xf32>
    %50 = vector.shape_cast %49 : vector<128xf32> to vector<1x128xf32>
    %51 = vector.broadcast %50 : vector<1x128xf32> to vector<8x128xf32>
    %52 = arith.mulf %39, %51 : vector<8x128xf32>
    %cst_21 = arith.constant dense<0.000000e+00> : vector<8xf32>
    %53 = vector.multi_reduction <add>, %52, %cst_21 [1] : vector<8x128xf32> to vector<8xf32>
    %54 = vector.shape_cast %53 : vector<8xf32> to vector<8x1xf32>
    %55 = tpu.concatenate %47, %54 in 1 : vector<8x1xf32>, vector<8x1xf32> -> vector<8x2xf32>
    %56 = vector.extract_strided_slice %1 {offsets = [3, 0], sizes = [1, 2], strides = [1, 1]} : vector<4x128xf32> to vector<1x2xf32>
    %57 = vector.shape_cast %56 : vector<1x2xf32> to vector<2xf32>
    %58 = vector.shape_cast %57 : vector<2xf32> to vector<1x2xf32>
    %59 = vector.broadcast %58 : vector<1x2xf32> to vector<8x2xf32>
    %60 = arith.addf %55, %59 : vector<8x2xf32>
    %c0_22 = arith.constant 0 : index
    %c0_23 = arith.constant 0 : index
    %61 = vector.load %arg6[%c0_22, %c0_23] : memref<8x2xf32, #tpu.memory_space<vmem>>, vector<8x2xf32>
    tpu.vector_store %arg6[%c0_22, %c0_23], %60 {strides = array<i32>} : memref<8x2xf32, #tpu.memory_space<vmem>>, vector<8x2xf32>,
    return
  }
  func.func @transform_0(%arg0: i32) -> (i32, i32) {
    %c0_i32 = arith.constant 0 : i32
    %c0_i32_0 = arith.constant 0 : i32
    return %arg0, %c0_i32 : i32, i32
  }
  func.func @transform_1(%arg0: i32) -> (i32, i32) {
    %c0_i32 = arith.constant 0 : i32
    %c0_i32_0 = arith.constant 0 : i32
    %c0_i32_1 = arith.constant 0 : i32
    return %c0_i32, %c0_i32_0 : i32, i32
  }
  func.func @transform_2(%arg0: i32) -> (i32, i32, i32) {
    %c0_i32 = arith.constant 0 : i32
    %c0_i32_0 = arith.constant 0 : i32
    %c0_i32_1 = arith.constant 0 : i32
    %c0_i32_2 = arith.constant 0 : i32
    return %c0_i32, %c0_i32_0, %c0_i32_1 : i32, i32, i32
  }
  func.func @transform_3(%arg0: i32) -> (i32, i32) {
    %c0_i32 = arith.constant 0 : i32
    %c0_i32_0 = arith.constant 0 : i32
    %c0_i32_1 = arith.constant 0 : i32
    return %c0_i32, %c0_i32_0 : i32, i32
  }
  func.func @transform_4(%arg0: i32) -> (i32, i32) {
    %c0_i32 = arith.constant 0 : i32
    %c0_i32_0 = arith.constant 0 : i32
    %c0_i32_1 = arith.constant 0 : i32
    return %c0_i32, %c0_i32_0 : i32, i32
  }
  func.func @transform_5(%arg0: i32) -> (i32, i32) {
    %c0_i32 = arith.constant 0 : i32
    %c0_i32_0 = arith.constant 0 : i32
    return %arg0, %c0_i32 : i32, i32
  }
}

</mosaic_0001>

<bundles_post_ra>
// kernel: discriminator_forward.1
= control target key start
LH: loop header
LB: loop body
LE: loop exit
PB: predicated region body
PF: predicated region fallthrough
CT: control target
= control target key end

     0   :  { %10 = vsyncpa [#allocation3], 0  ;;  %s429_s0 = inlined_call_operand.hbm [shape: f32[2,8], index: 0, kind: input, shape index: {}]   ;;  %s430_s1 = inlined_call_operand.hbm [shape: f32[8,128], index: 1, kind: input, shape index: {}]   ;;  %s431_s2 = inlined_call_operand.hbm [shape: f32[2,128,128], index: 2, kind: input, shape index: {}]   ;;  %s432_s3 = inlined_call_operand.vmem [shape: f32[2,128], index: 3, kind: input, shape index: {}]   ;;  %s433_s4 = inlined_call_operand.hbm [shape: f32[4,128], index: 4, kind: input, shape index: {}]   ;;  %s434_s5 = inlined_call_operand.hbm [shape: f32[2,2], index: 5, kind: output, shape index: {}]  }
   0x1   :  { %11 = vsyncpa [#allocation6], 0 }
   0x2   :  { %12 = vsyncpa [#allocation9], 0 }
   0x3   :  { %13 = vsyncpa [#allocation4], 0  ;;  %s32_s20 = sshll.u32 %s430_s1, 4  ;;  %s33_s20 = int_to_ptr.hbm [resolvable:$true] %s32_s20 }
   0x4   :  { %17 = vsyncadd [#allocation3], 96  ;;  %s366_s21 = smov [#allocation5]   ;;  %s18_s25 = sshll.u32 %s429_s0, 4  ;;  %s19_s25 = int_to_ptr.hbm [resolvable:$true] %s18_s25 }
   0x5   :  { %s34_s22 = sshll.u32 %s366_s21, 4  ;;  %s367_s26 = smov [#allocation2]   ;;  %s35_s22 = int_to_ptr.vmem [resolvable:$true] %s34_s22 }
   0x6   :  { %37 = dma.hbm_to_vmem [thread:$0]  %s33_s20, 128, %s35_s22, [#allocation6]  }
   0x7   :  { %s20_s27 = sshll.u32 %s367_s26, 4  ;;  %s368_s28 = smov 32   ;;  %s21_s27 = int_to_ptr.vmem [resolvable:$true] %s20_s27 }
   0x8   :  { %s369_s29 = smov 2   ;;  %s42_s6 = sshll.u32 %s431_s2, 4  ;;  %s43_s6 = int_to_ptr.hbm [resolvable:$true] %s42_s6 }
   0x9   :  { %26 = dma.hbm_to_vmem [thread:$0]  %s19_s25, 32, %s21_s27, [#allocation3], %s368_s28, %s368_s28, %s369_s29  }
   0xa   :  { %s370_s7 = smov [#allocation7]   ;;  %s58_s10 = sshll.u32 %s433_s4, 4  ;;  %s59_s10 = int_to_ptr.hbm [resolvable:$true] %s58_s10 }
   0xb   :  { %s44_s8 = sshll.u32 %s370_s7, 4  ;;  %s371_s11 = smov 128   ;;  %s45_s8 = int_to_ptr.vmem [resolvable:$true] %s44_s8 }
   0xc   :  { %s372_s12 = smov 8   ;;  %s373_s13 = smov [#allocation8]  }
   0xd   :  { %50 = dma.hbm_to_vmem [thread:$0]  %s43_s6, 4096, %s45_s8, [#allocation6], %s371_s11, %s371_s11, %s372_s12  }
   0xe   :  { %s60_s14 = sshll.u32 %s373_s13, 4  ;;  %s61_s14 = int_to_ptr.vmem [resolvable:$true] %s60_s14 }
   0xf   :  { %63 = dma.hbm_to_vmem [thread:$0]  %s59_s10, 64, %s61_s14, [#allocation9]  }
  0x10   :  { %358 = dma.done.wait [#allocation3], 128  }
  0x11   :  { %359 = vsyncadd [#allocation3], 4294967168 }
  0x12   :  { %360 = dma.done.wait [#allocation6], 4224  }
  0x13   :  { %361 = vsyncadd [#allocation6], 4294963072 }
  0x14   :  { %362 = dma.done.wait [#allocation9], 64  }
  0x15   :  { %363 = vsyncadd [#allocation9], 4294967232  ;;  %vm84_vm0 = vcmask 64512   ;;  %v82_v0 = vld [vmem:[#allocation5] sm:$0xff]  ;;  %v80_v1 = vld [vmem:[#allocation2] sm:$0xff]  ;;  %vm201_vm4 = vcmask 7168  }
  0x16   :  { %v126_v2 = vld [vmem:[#allocation7 + $0x78] sm:$0xff]  ;;  %103 = vmatpush.msra.mxu0 %v82_v0  ;;  %v125_v3 = vld [vmem:[#allocation7 + $0x70] sm:$0xff]  ;;  %v124_v4 = vld [vmem:[#allocation7 + $0x68] sm:$0xff]  ;;  %vm205_vm5 = vcmask 15360  }
  0x17   :  { %128 = vmatpush.msra.mxu1 %v126_v2  ;;  %228 = vmatmul.msk.f32.vlgmr.msra.gmra.mxu0 %vm84_vm0, %v80_v1  ;;  %v123_v5 = vld [vmem:[#allocation7 + $0x60] sm:$0xff]  ;;  %v122_v6 = vld [vmem:[#allocation7 + $0x58] sm:$0xff]  ;;  %v121_v7 = vld [vmem:[#allocation7 + $0x50] sm:$0xff] }
  0x18   :  { %v120_v8 = vld [vmem:[#allocation7 + $0x48] sm:$0xff]  ;;  %v119_v9 = vld [vmem:[#allocation7 + $0x40] sm:$0xff]  ;;  %v118_v10 = vld [vmem:[#allocation7 + $0x38] sm:$0xff] }
  0x19   :  { %129 = vmatpush.msra.mxu1 %v125_v3  ;;  %v117_v11 = vld [vmem:[#allocation7 + $0x30] sm:$0xff]  ;;  %v116_v12 = vld [vmem:[#allocation7 + $0x28] sm:$0xff]  ;;  %v115_v13 = vld [vmem:[#allocation7 + $0x20] sm:$0xff] }
  0x1a   :  { %v114_v14 = vld [vmem:[#allocation7 + $0x18] sm:$0xff]  ;;  %v113_v15 = vld [vmem:[#allocation7 + $0x10] sm:$0xff]  ;;  %v112_v16 = vld [vmem:[#allocation7 + $0x8] sm:$0xff] }
  0x1b   :  { %130 = vmatpush.msra.mxu1 %v124_v4  ;;  %v111_v17 = vld [vmem:[#allocation7] sm:$0xff]  ;;  %v167_v18 = vld [vmem:[#allocation7 + $0xf8] sm:$0xff]  ;;  %v166_v19 = vld [vmem:[#allocation7 + $0xf0] sm:$0xff] }
  0x1c   :  { %169 = vmatpush.msra.mxu2 %v167_v18  ;;  %v165_v20 = vld [vmem:[#allocation7 + $0xe8] sm:$0xff]  ;;  %v164_v21 = vld [vmem:[#allocation7 + $0xe0] sm:$0xff]  ;;  %v163_v22 = vld [vmem:[#allocation7 + $0xd8] sm:$0xff] }
  0x1d   :  { %131 = vmatpush.msra.mxu1 %v123_v5  ;;  %v162_v23 = vld [vmem:[#allocation7 + $0xd0] sm:$0xff]  ;;  %v161_v24 = vld [vmem:[#allocation7 + $0xc8] sm:$0xff]  ;;  %v160_v25 = vld [vmem:[#allocation7 + $0xc0] sm:$0xff] }
  0x1e   :  { %170 = vmatpush.msra.mxu2 %v166_v19  ;;  %v159_v26 = vld [vmem:[#allocation7 + $0xb8] sm:$0xff]  ;;  %v158_v27 = vld [vmem:[#allocation7 + $0xb0] sm:$0xff]  ;;  %v157_v28 = vld [vmem:[#allocation7 + $0xa8] sm:$0xff] }
  0x1f   :  { %132 = vmatpush.msra.mxu1 %v122_v6  ;;  %v81_v29 = vld [vmem:[#allocation8] sm:$0xf]  ;;  %v155_v31 = vld [vmem:[#allocation7 + $0x98] sm:$0xff]  ;;  %v154_v37 = vld [vmem:[#allocation7 + $0x90] sm:$0xff] }
  0x20   :  { %171 = vmatpush.msra.mxu2 %v165_v20  ;;  %v156_v30 = vld [vmem:[#allocation7 + $0xa0] sm:$0xff]  ;;  %v83_v32 = vperm.slane %v81_v29, 0  ;;  %v153_v38 = vld [vmem:[#allocation7 + $0x88] sm:$0xff]  ;;  %v127_v40 = vperm.slane %v81_v29, 1  ;;  %v168_v45 = vperm.slane %v81_v29, 2  ;;  %v203_v56 = vperm.slane %v81_v29, 3 }
  0x21   :  { %133 = vmatpush.msra.mxu1 %v121_v7  ;;  %v152_v39 = vld [vmem:[#allocation7 + $0x80] sm:$0xff]  ;;  %v192_v46 = vld [vmem:[%s432_s3] sm:$0x3] }
  0x22   :  { %172 = vmatpush.msra.mxu2 %v164_v21  ;;  %v193_v49 = vperm.slane %v192_v46, 0  ;;  %v197_v53 = vperm.slane %v192_v46, 1 }
  0x23   :  { %134 = vmatpush.msra.mxu1 %v120_v8 }
  0x24   :  { %173 = vmatpush.msra.mxu2 %v163_v22 }
  0x25   :  { %135 = vmatpush.msra.mxu1 %v119_v9 }
  0x26   :  { %174 = vmatpush.msra.mxu2 %v162_v23 }
  0x27   :  { %136 = vmatpush.msra.mxu1 %v118_v10 }
  0x28   :  { %175 = vmatpush.msra.mxu2 %v161_v24 }
  0x29   :  { %137 = vmatpush.msra.mxu1 %v117_v11 }
  0x2a   :  { %176 = vmatpush.msra.mxu2 %v160_v25 }
  0x2b   :  { %138 = vmatpush.msra.mxu1 %v116_v12 }
  0x2c   :  { %177 = vmatpush.msra.mxu2 %v159_v26 }
  0x2d   :  { %139 = vmatpush.msra.mxu1 %v115_v13 }
  0x2e   :  { %178 = vmatpush.msra.mxu2 %v158_v27 }
  0x2f   :  { %140 = vmatpush.msra.mxu1 %v114_v14 }
  0x30   :  { %179 = vmatpush.msra.mxu2 %v157_v28 }
  0x31   :  { %141 = vmatpush.msra.mxu1 %v113_v15 }
  0x32   :  { %180 = vmatpush.msra.mxu2 %v156_v30 }
  0x33   :  { %142 = vmatpush.msra.mxu1 %v112_v16 }
  0x34   :  { %181 = vmatpush.msra.mxu2 %v155_v31 }
  0x35   :  { %143 = vmatpush.msra.mxu1 %v111_v17 }
  0x36   :  { %182 = vmatpush.msra.mxu2 %v154_v37 }
  0x38   :  { %183 = vmatpush.msra.mxu2 %v153_v38 }
  0x3a   :  { %184 = vmatpush.msra.mxu2 %v152_v39 }
  0x94   :  { %v105_v33 = vpop.f32.mrf.mxu0 }
  0x95   :  { %v106_v34 = vadd.f32 %v105_v33, %v83_v32 }
  0x97   :  { %vm108_vm1 = vcmp.gt.f32.partialorder %v106_v34, 0.0  ;;  %v109_v35 = vmul.f32 0.1, %v106_v34 }
  0x99   :  { %v110_v36 = vsel %vm108_vm1, %v106_v34, %v109_v35 }
  0x9a   :  { %144 = vmatmul.f32.vlgmr.msra.gmra.mxu1 %v110_v36 }
 0x117   :  { %v145_v41 = vpop.f32.mrf.mxu1 }
 0x118   :  { %v146_v42 = vadd.f32 %v145_v41, %v127_v40 }
 0x11a   :  { %vm148_vm2 = vcmp.gt.f32.partialorder %v146_v42, 0.0  ;;  %v149_v43 = vmul.f32 0.1, %v146_v42 }
 0x11c   :  { %v150_v44 = vsel %vm148_vm2, %v146_v42, %v149_v43 }
 0x11d   :  { %185 = vmatmul.f32.vlgmr.msra.gmra.mxu2 %v150_v44 }
 0x1a0   :  { %v186_v47 = vpop.f32.mrf.mxu2 }
 0x1a1   :  { %v187_v48 = vadd.f32 %v186_v47, %v168_v45 }
 0x1a3   :  { %v190_v50 = vmul.f32 0.1, %v187_v48  ;;  %vm189_vm3 = vcmp.gt.f32.partialorder %v187_v48, 0.0 }
 0x1a5   :  { %v191_v51 = vsel %vm189_vm3, %v187_v48, %v190_v50 }
 0x1a6   :  { %v194_v52 = vmul.f32 %v193_v49, %v191_v51  ;;  %v198_v54 = vmul.f32 %v197_v53, %v191_v51 }
 0x1a8   :  { %195 = vadd.xlane.f32.xlu0 %v194_v52 }
 0x1b0   :  { %199 = vadd.xlane.f32.xlu0 %v198_v54 }
 0x21b   :  { %v196_v55 = vpop.xlane.xlu0 %195 }
 0x223   :  { %v200_v57 = vpop.xlane.xlu0 %199 }
 0x224   :  { %v202_v58 = vsel %vm201_vm4, %v196_v55, %v200_v57 }
 0x225   :  { %v204_v59 = vadd.f32 %v203_v56, %v202_v58 }
 0x227   :  { %206 = vst.msk [vmem:[#allocation10] sm:$0xff] %vm205_vm5, %v204_v59 }
 0x228   :  { %210 = vsyncadd [#allocation4], 96  ;;  %s213_s16 = sshll.u32 %s434_s5, 4  ;;  %s374_s17 = smov [#allocation10]   ;;  %s214_s16 = int_to_ptr.hbm [resolvable:$true] %s213_s16 }
 0x229   :  { %s211_s18 = sshll.u32 %s374_s17, 4  ;;  %s212_s18 = int_to_ptr.vmem [resolvable:$true] %s211_s18 }
 0x22a   :  { %219 = dma.vmem_to_hbm [thread:$0]  %s212_s18, 32, %s214_s16, [#allocation4], %s368_s28, %s368_s28, %s369_s29  }
 0x22b   :  { %364 = dma.done.wait [#allocation4], 128  }
 0x22c   :  { %365 = vsyncadd [#allocation4], 4294967168 }
 0x22d   :  { %224 = vsyncpa [#allocation3], 1 }
 0x22e   :  { %225 = vsyncpa [#allocation6], 1 }
 0x22f   :  { %226 = vsyncpa [#allocation9], 1 }
 0x230   :  { %227 = vsyncpa [#allocation4], 1 }

</bundles_post_ra>
